<compile_context>
chip_gen: v7x
topology: tpu7x:2x2x1
jax: 0.10.0
libtpu: 0.0.40
codegen_flags: <defaults>
</compile_context>

<pallas_src>
import math
from functools import partial

import numpy as np
import jax
import jax.numpy as jnp
from jax.experimental import pallas as pl
from jax.experimental.pallas import tpu as pltpu

NUMBER_SIZE = 16
EMB = int(math.ceil(math.log(NUMBER_SIZE, 2)))  # 4

GROUP = NUMBER_SIZE             # features per sample (lanes per packed group) = 16
GROUPS_PER_ROW = 8              # samples packed per 128-lane row
LANES = GROUP * GROUPS_PER_ROW  # 128

# Layer sizes exactly as in the PyTorch __init__:
#   fc1: 16 -> 8, fc2: 8 -> 4, fc3: 4 -> 4, fc5: 4 -> 8, fc6: 8 -> 8, fc7: 8 -> 16
LAYER_DIMS = [
    (NUMBER_SIZE, NUMBER_SIZE // 2),       # fc1
    (NUMBER_SIZE // 2, NUMBER_SIZE // 4),  # fc2
    (NUMBER_SIZE // 4, EMB),               # fc3
    (EMB, EMB * 2),                        # fc5
    (EMB * 2, NUMBER_SIZE // 2),           # fc6
    (NUMBER_SIZE // 2, NUMBER_SIZE),       # fc7
]
NUM_LAYERS = len(LAYER_DIMS)


def _ae_kernel(x_ref, w_ref, b_ref, out_ref):
    """Fused forward over one lane-dense batch tile.

    x_ref:   (TR, 128) f32  -- 8 samples per row, 16 lanes per sample.
    w_ref:   (NUM_LAYERS+1, 128, 128) bf16 -- block-diag layer weights; last
             entry is the block-diag all-ones matrix (softmax group-sum).
    b_ref:   (NUM_LAYERS, 1, 128) f32 -- block-replicated biases.
    out_ref: (TR, 128) f32  -- per-sample softmax, packed like x.
    """
    h = x_ref[...]  # f32

    # Six block-diagonal Linear layers on the MXU in bf16, f32 accumulation.
    # ReLU on all but the last layer (fc7 feeds the softmax directly).
    for layer in range(NUM_LAYERS):
        h = jnp.dot(h.astype(jnp.bfloat16), w_ref[layer],
                    preferred_element_type=jnp.float32) + b_ref[layer]
        if layer < NUM_LAYERS - 1:
            h = jnp.maximum(h, 0.0)

    # Per-sample softmax over each 16-lane group (F.softmax defaults to dim=1).
    # The row-wide max is constant within every group, so it is an exact
    # stabilizer (no segmented in-group max needed).
    m = jnp.max(h, axis=-1, keepdims=True)
    e = jnp.exp(h - m)                       # f32, EUP
    # Group sums broadcast to every lane of the group via the block-diag ones
    # matrix stored as "layer" NUM_LAYERS of the weight slab.
    denom = jnp.dot(e.astype(jnp.bfloat16), w_ref[NUM_LAYERS],
                    preferred_element_type=jnp.float32)
    # Guard: if a co-packed sample's logits are so far below the row max that
    # its exps underflow, denom would be 0 -> inf/NaN; floor it so that sample
    # degrades to zeros instead (valid samples are unaffected).
    denom = jnp.maximum(denom, 1e-30)
    r = pl.reciprocal(denom, approx=True)    # EUP path (otherwise idle)
    r = r * (2.0 - denom * r)                # one Newton step -> ~f32-exact
    out_ref[...] = (e * r).astype(out_ref.dtype)


def pack_params(params):
    """Pack per-layer (W, b) in PyTorch nn.Linear layout (W: (out,in), b: (out,))
    into block-diagonal slabs for the lane-dense packed layout.

    Call ONCE per set of weights (host numpy + one H2D transfer); do not put
    this on the per-forward hot path."""
    w_all = np.zeros((NUM_LAYERS + 1, LANES, LANES), np.float32)
    b_all = np.zeros((NUM_LAYERS, 1, LANES), np.float32)
    for layer, ((fan_in, fan_out), (W, b)) in enumerate(zip(LAYER_DIMS, params)):
        wt = np.zeros((GROUP, GROUP), np.float32)
        wt[:fan_in, :fan_out] = np.asarray(W, np.float32).T   # y = x @ W.T + b
        bp = np.zeros((GROUP,), np.float32)
        bp[:fan_out] = np.asarray(b, np.float32)
        for g in range(GROUPS_PER_ROW):
            w_all[layer, g * GROUP:(g + 1) * GROUP, g * GROUP:(g + 1) * GROUP] = wt
            b_all[layer, 0, g * GROUP:(g + 1) * GROUP] = bp
    # Softmax group-sum "layer": block-diagonal all-ones.
    for g in range(GROUPS_PER_ROW):
        w_all[NUM_LAYERS, g * GROUP:(g + 1) * GROUP, g * GROUP:(g + 1) * GROUP] = 1.0
    # Weights in bf16 (halves the resident slab + its DMA); biases stay f32
    # since they add into the f32 accumulator.
    return jnp.asarray(w_all, jnp.bfloat16), jnp.asarray(b_all, jnp.float32)


@partial(jax.jit, static_argnames=("block_rows", "min_steps"))
def ae_nosecond_forward(x, w_all, b_all, *, block_rows=2048, min_steps=4):
    """x: (B, 16) float32.  w_all/b_all: pre-packed slabs from pack_params.

    block_rows = max packed 128-lane rows per grid step (8 samples per row).
    min_steps  = minimum grid steps so the "parallel" batch axis can shard
                 across both TensorCores on v7x even for medium batches.
    """
    B = x.shape[0]
    b8 = -(-B // GROUPS_PER_ROW) * GROUPS_PER_ROW   # pad only to a multiple of 8
    if b8 != B:
        x = jnp.pad(x, ((0, b8 - B), (0, 0)))       # <= 7 extra samples
    rows = b8 // GROUPS_PER_ROW
    x_packed = x.reshape(rows, LANES)               # free, contiguous reinterpretation

    # Tile size: as big as block_rows allows, but capped so there are at least
    # `min_steps` grid steps (dual-TC on v7x); keep the (8,128) tiling rule.
    if rows <= 8:
        tr = rows                                   # full-dim block for tiny batches
    else:
        tr = min(block_rows, -(-rows // min_steps))
        tr = max(8, (tr // 8) * 8)
    grid = (pl.cdiv(rows, tr),)                     # partial last block is masked by Pallas

    out_packed = pl.pallas_call(
        _ae_kernel,
        out_shape=jax.ShapeDtypeStruct((rows, LANES), jnp.float32),
        grid=grid,
        in_specs=[
            pl.BlockSpec((tr, LANES), lambda i: (i, 0)),
            # Constant block index: weight/bias slabs are copied in once and
            # stay resident in VMEM across all grid steps.
            pl.BlockSpec((NUM_LAYERS + 1, LANES, LANES), lambda i: (0, 0, 0)),
            pl.BlockSpec((NUM_LAYERS, 1, LANES), lambda i: (0, 0, 0)),
        ],
        out_specs=pl.BlockSpec((tr, LANES), lambda i: (i, 0)),
        compiler_params=pltpu.CompilerParams(
            dimension_semantics=("parallel",),      # shard batch across TCs on v7x
        ),
    )(x_packed, w_all, b_all)

    return out_packed.reshape(b8, NUMBER_SIZE)[:B]


def init_params(key):
    """Deterministic init mimicking nn.Linear's U(-1/sqrt(fan_in), 1/sqrt(fan_in)),
    stored in PyTorch layout: W (out_features, in_features), b (out_features,)."""
    params = []
    for (fan_in, fan_out) in LAYER_DIMS:
        key, kw, kb = jax.random.split(key, 3)
        bound = 1.0 / math.sqrt(fan_in)
        W = jax.random.uniform(kw, (fan_out, fan_in), jnp.float32, -bound, bound)
        b = jax.random.uniform(kb, (fan_out,), jnp.float32, -bound, bound)
        params.append((W, b))
    return params


def reference_forward(x, params):
    h = x
    for i, (W, b) in enumerate(params):
        h = h @ W.T + b
        if i < len(params) - 1:
            h = jnp.maximum(h, 0.0)
    return jax.nn.softmax(h, axis=-1)


if __name__ == "__main__":
    key = jax.random.PRNGKey(0)
    key, kx = jax.random.split(key)

    # B deliberately not a multiple of 8: exercises the small pad-to-8 path,
    # a multi-step parallel grid (rows=26, tr=8 -> grid=(4,)), and the masked
    # partial last block.
    B = 203
    x = jax.random.normal(kx, (B, NUMBER_SIZE), jnp.float32)
    params = init_params(key)

    # Pack weights ONCE, outside the per-call path (review item: hoist packing).
    w_all, b_all = pack_params(params)

    out = ae_nosecond_forward(x, w_all, b_all)
    out = jax.block_until_ready(out)

    ref = reference_forward(x, params)
    assert out.shape == (B, NUMBER_SIZE)
    # bf16 matmuls -> ~1e-3..1e-2 deviation vs the f32 reference (per review).
    assert jnp.allclose(out, ref, atol=1e-2, rtol=1e-2), "mismatch vs reference"
    # rows of a softmax sum to ~1 (denominator accumulated from bf16 exps)
    assert jnp.allclose(jnp.sum(out, axis=-1), jnp.ones((B,)), atol=1e-2)

    print("KERNEL_OK")
</pallas_src>

<mosaic_0001>
module attributes {stable_mosaic.version = 11 : i64} {
  func.func @_ae_kernel(%arg0: i32, %arg1: memref<8x128xf32, #tpu.memory_space<vmem>>, %arg2: memref<7x128x128xbf16, #tpu.memory_space<vmem>>, %arg3: memref<6x1x128xf32, #tpu.memory_space<vmem>>, %arg4: memref<8x128xf32, #tpu.memory_space<vmem>>) attributes {dimension_semantics = [#tpu.dimension_semantics<parallel>], iteration_bounds = array<i64: 4>, scalar_prefetch = 0 : i64, scratch_operands = 0 : i64, tpu.core_type = #tpu.core_type<tc>, window_params = [{transform_indices = @transform_0, window_bounds = array<i64: 8, 128>}, {pipeline_mode = #tpu.pipeline_mode<synchronous>, transform_indices = @transform_1, window_bounds = array<i64: 7, 128, 128>}, {pipeline_mode = #tpu.pipeline_mode<synchronous>, transform_indices = @transform_2, window_bounds = array<i64: 6, 1, 128>}, {transform_indices = @transform_3, window_bounds = array<i64: 8, 128>}]} {
    %c0 = arith.constant 0 : index
    %c0_0 = arith.constant 0 : index
    %0 = vector.load %arg1[%c0, %c0_0] : memref<8x128xf32, #tpu.memory_space<vmem>>, vector<8x128xf32>
    %1 = arith.truncf %0 : vector<8x128xf32> to vector<8x128xbf16>
    %c0_1 = arith.constant 0 : index
    %c0_2 = arith.constant 0 : index
    %c0_3 = arith.constant 0 : index
    %2 = vector.load %arg2[%c0_1, %c0_2, %c0_3] : memref<7x128x128xbf16, #tpu.memory_space<vmem>>, vector<1x128x128xbf16>
    %3 = vector.shape_cast %2 : vector<1x128x128xbf16> to vector<128x128xbf16>
    %cst = arith.constant dense<0.000000e+00> : vector<8x128xf32>
    %4 = tpu.matmul %1, %3, %cst {dimension_numbers = #tpu.dot_dimension_numbers<[1], [0], [0], [1], [0, 0, 1, 1], [], []>} : vector<8x128xbf16>, vector<128x128xbf16>, vector<8x128xf32> -> vector<8x128xf32>
    %c0_4 = arith.constant 0 : index
    %c0_5 = arith.constant 0 : index
    %c0_6 = arith.constant 0 : index
    %5 = vector.load %arg3[%c0_4, %c0_5, %c0_6] : memref<6x1x128xf32, #tpu.memory_space<vmem>>, vector<1x1x128xf32>
    %6 = vector.shape_cast %5 : vector<1x1x128xf32> to vector<1x128xf32>
    %7 = vector.broadcast %6 : vector<1x128xf32> to vector<8x128xf32>
    %8 = arith.addf %4, %7 : vector<8x128xf32>
    %cst_7 = arith.constant 0.000000e+00 : f32
    %9 = vector.broadcast %cst_7 : f32 to vector<8x128xf32>
    %10 = arith.maximumf %8, %9 : vector<8x128xf32>
    %11 = arith.truncf %10 : vector<8x128xf32> to vector<8x128xbf16>
    %c1 = arith.constant 1 : index
    %c0_8 = arith.constant 0 : index
    %c0_9 = arith.constant 0 : index
    %12 = vector.load %arg2[%c1, %c0_8, %c0_9] : memref<7x128x128xbf16, #tpu.memory_space<vmem>>, vector<1x128x128xbf16>
    %13 = vector.shape_cast %12 : vector<1x128x128xbf16> to vector<128x128xbf16>
    %cst_10 = arith.constant dense<0.000000e+00> : vector<8x128xf32>
    %14 = tpu.matmul %11, %13, %cst_10 {dimension_numbers = #tpu.dot_dimension_numbers<[1], [0], [0], [1], [0, 0, 1, 1], [], []>} : vector<8x128xbf16>, vector<128x128xbf16>, vector<8x128xf32> -> vector<8x128xf32>
    %c1_11 = arith.constant 1 : index
    %c0_12 = arith.constant 0 : index
    %c0_13 = arith.constant 0 : index
    %15 = vector.load %arg3[%c1_11, %c0_12, %c0_13] : memref<6x1x128xf32, #tpu.memory_space<vmem>>, vector<1x1x128xf32>
    %16 = vector.shape_cast %15 : vector<1x1x128xf32> to vector<1x128xf32>
    %17 = vector.broadcast %16 : vector<1x128xf32> to vector<8x128xf32>
    %18 = arith.addf %14, %17 : vector<8x128xf32>
    %cst_14 = arith.constant 0.000000e+00 : f32
    %19 = vector.broadcast %cst_14 : f32 to vector<8x128xf32>
    %20 = arith.maximumf %18, %19 : vector<8x128xf32>
    %21 = arith.truncf %20 : vector<8x128xf32> to vector<8x128xbf16>
    %c2 = arith.constant 2 : index
    %c0_15 = arith.constant 0 : index
    %c0_16 = arith.constant 0 : index
    %22 = vector.load %arg2[%c2, %c0_15, %c0_16] : memref<7x128x128xbf16, #tpu.memory_space<vmem>>, vector<1x128x128xbf16>
    %23 = vector.shape_cast %22 : vector<1x128x128xbf16> to vector<128x128xbf16>
    %cst_17 = arith.constant dense<0.000000e+00> : vector<8x128xf32>
    %24 = tpu.matmul %21, %23, %cst_17 {dimension_numbers = #tpu.dot_dimension_numbers<[1], [0], [0], [1], [0, 0, 1, 1], [], []>} : vector<8x128xbf16>, vector<128x128xbf16>, vector<8x128xf32> -> vector<8x128xf32>
    %c2_18 = arith.constant 2 : index
    %c0_19 = arith.constant 0 : index
    %c0_20 = arith.constant 0 : index
    %25 = vector.load %arg3[%c2_18, %c0_19, %c0_20] : memref<6x1x128xf32, #tpu.memory_space<vmem>>, vector<1x1x128xf32>
    %26 = vector.shape_cast %25 : vector<1x1x128xf32> to vector<1x128xf32>
    %27 = vector.broadcast %26 : vector<1x128xf32> to vector<8x128xf32>
    %28 = arith.addf %24, %27 : vector<8x128xf32>
    %cst_21 = arith.constant 0.000000e+00 : f32
    %29 = vector.broadcast %cst_21 : f32 to vector<8x128xf32>
    %30 = arith.maximumf %28, %29 : vector<8x128xf32>
    %31 = arith.truncf %30 : vector<8x128xf32> to vector<8x128xbf16>
    %c3 = arith.constant 3 : index
    %c0_22 = arith.constant 0 : index
    %c0_23 = arith.constant 0 : index
    %32 = vector.load %arg2[%c3, %c0_22, %c0_23] : memref<7x128x128xbf16, #tpu.memory_space<vmem>>, vector<1x128x128xbf16>
    %33 = vector.shape_cast %32 : vector<1x128x128xbf16> to vector<128x128xbf16>
    %cst_24 = arith.constant dense<0.000000e+00> : vector<8x128xf32>
    %34 = tpu.matmul %31, %33, %cst_24 {dimension_numbers = #tpu.dot_dimension_numbers<[1], [0], [0], [1], [0, 0, 1, 1], [], []>} : vector<8x128xbf16>, vector<128x128xbf16>, vector<8x128xf32> -> vector<8x128xf32>
    %c3_25 = arith.constant 3 : index
    %c0_26 = arith.constant 0 : index
    %c0_27 = arith.constant 0 : index
    %35 = vector.load %arg3[%c3_25, %c0_26, %c0_27] : memref<6x1x128xf32, #tpu.memory_space<vmem>>, vector<1x1x128xf32>
    %36 = vector.shape_cast %35 : vector<1x1x128xf32> to vector<1x128xf32>
    %37 = vector.broadcast %36 : vector<1x128xf32> to vector<8x128xf32>
    %38 = arith.addf %34, %37 : vector<8x128xf32>
    %cst_28 = arith.constant 0.000000e+00 : f32
    %39 = vector.broadcast %cst_28 : f32 to vector<8x128xf32>
    %40 = arith.maximumf %38, %39 : vector<8x128xf32>
    %41 = arith.truncf %40 : vector<8x128xf32> to vector<8x128xbf16>
    %c4 = arith.constant 4 : index
    %c0_29 = arith.constant 0 : index
    %c0_30 = arith.constant 0 : index
    %42 = vector.load %arg2[%c4, %c0_29, %c0_30] : memref<7x128x128xbf16, #tpu.memory_space<vmem>>, vector<1x128x128xbf16>
    %43 = vector.shape_cast %42 : vector<1x128x128xbf16> to vector<128x128xbf16>
    %cst_31 = arith.constant dense<0.000000e+00> : vector<8x128xf32>
    %44 = tpu.matmul %41, %43, %cst_31 {dimension_numbers = #tpu.dot_dimension_numbers<[1], [0], [0], [1], [0, 0, 1, 1], [], []>} : vector<8x128xbf16>, vector<128x128xbf16>, vector<8x128xf32> -> vector<8x128xf32>
    %c4_32 = arith.constant 4 : index
    %c0_33 = arith.constant 0 : index
    %c0_34 = arith.constant 0 : index
    %45 = vector.load %arg3[%c4_32, %c0_33, %c0_34] : memref<6x1x128xf32, #tpu.memory_space<vmem>>, vector<1x1x128xf32>
    %46 = vector.shape_cast %45 : vector<1x1x128xf32> to vector<1x128xf32>
    %47 = vector.broadcast %46 : vector<1x128xf32> to vector<8x128xf32>
    %48 = arith.addf %44, %47 : vector<8x128xf32>
    %cst_35 = arith.constant 0.000000e+00 : f32
    %49 = vector.broadcast %cst_35 : f32 to vector<8x128xf32>
    %50 = arith.maximumf %48, %49 : vector<8x128xf32>
    %51 = arith.truncf %50 : vector<8x128xf32> to vector<8x128xbf16>
    %c5 = arith.constant 5 : index
    %c0_36 = arith.constant 0 : index
    %c0_37 = arith.constant 0 : index
    %52 = vector.load %arg2[%c5, %c0_36, %c0_37] : memref<7x128x128xbf16, #tpu.memory_space<vmem>>, vector<1x128x128xbf16>
    %53 = vector.shape_cast %52 : vector<1x128x128xbf16> to vector<128x128xbf16>
    %cst_38 = arith.constant dense<0.000000e+00> : vector<8x128xf32>
    %54 = tpu.matmul %51, %53, %cst_38 {dimension_numbers = #tpu.dot_dimension_numbers<[1], [0], [0], [1], [0, 0, 1, 1], [], []>} : vector<8x128xbf16>, vector<128x128xbf16>, vector<8x128xf32> -> vector<8x128xf32>
    %c5_39 = arith.constant 5 : index
    %c0_40 = arith.constant 0 : index
    %c0_41 = arith.constant 0 : index
    %55 = vector.load %arg3[%c5_39, %c0_40, %c0_41] : memref<6x1x128xf32, #tpu.memory_space<vmem>>, vector<1x1x128xf32>
    %56 = vector.shape_cast %55 : vector<1x1x128xf32> to vector<1x128xf32>
    %57 = vector.broadcast %56 : vector<1x128xf32> to vector<8x128xf32>
    %58 = arith.addf %54, %57 : vector<8x128xf32>
    %cst_42 = arith.constant dense<0xFF800000> : vector<8xf32>
    %59 = vector.multi_reduction <maximumf>, %58, %cst_42 [1] : vector<8x128xf32> to vector<8xf32>
    %60 = vector.shape_cast %59 : vector<8xf32> to vector<8x1xf32>
    %61 = vector.broadcast %60 : vector<8x1xf32> to vector<8x128xf32>
    %62 = arith.subf %58, %61 : vector<8x128xf32>
    %63 = math.exp %62 : vector<8x128xf32>
    %64 = arith.truncf %63 : vector<8x128xf32> to vector<8x128xbf16>
    %c6 = arith.constant 6 : index
    %c0_43 = arith.constant 0 : index
    %c0_44 = arith.constant 0 : index
    %65 = vector.load %arg2[%c6, %c0_43, %c0_44] : memref<7x128x128xbf16, #tpu.memory_space<vmem>>, vector<1x128x128xbf16>
    %66 = vector.shape_cast %65 : vector<1x128x128xbf16> to vector<128x128xbf16>
    %cst_45 = arith.constant dense<0.000000e+00> : vector<8x128xf32>
    %67 = tpu.matmul %64, %66, %cst_45 {dimension_numbers = #tpu.dot_dimension_numbers<[1], [0], [0], [1], [0, 0, 1, 1], [], []>} : vector<8x128xbf16>, vector<128x128xbf16>, vector<8x128xf32> -> vector<8x128xf32>
    %cst_46 = arith.constant 1.000000e-30 : f32
    %68 = vector.broadcast %cst_46 : f32 to vector<8x128xf32>
    %69 = arith.maximumf %67, %68 : vector<8x128xf32>
    %70 = tpu.reciprocal %69 {approx = true} : vector<8x128xf32> -> vector<8x128xf32>
    %71 = arith.mulf %69, %70 : vector<8x128xf32>
    %cst_47 = arith.constant 2.000000e+00 : f32
    %72 = vector.broadcast %cst_47 : f32 to vector<8x128xf32>
    %73 = arith.subf %72, %71 : vector<8x128xf32>
    %74 = arith.mulf %70, %73 : vector<8x128xf32>
    %75 = arith.mulf %63, %74 : vector<8x128xf32>
    %c0_48 = arith.constant 0 : index
    %c0_49 = arith.constant 0 : index
    %76 = vector.load %arg4[%c0_48, %c0_49] : memref<8x128xf32, #tpu.memory_space<vmem>>, vector<8x128xf32>
    tpu.vector_store %arg4[%c0_48, %c0_49], %75 {strides = array<i32>} : memref<8x128xf32, #tpu.memory_space<vmem>>, vector<8x128xf32>,
    return
  }
  func.func @transform_0(%arg0: i32) -> (i32, i32) {
    %c0_i32 = arith.constant 0 : i32
    %c0_i32_0 = arith.constant 0 : i32
    return %arg0, %c0_i32 : i32, i32
  }
  func.func @transform_1(%arg0: i32) -> (i32, i32, i32) {
    %c0_i32 = arith.constant 0 : i32
    %c0_i32_0 = arith.constant 0 : i32
    %c0_i32_1 = arith.constant 0 : i32
    %c0_i32_2 = arith.constant 0 : i32
    return %c0_i32, %c0_i32_0, %c0_i32_1 : i32, i32, i32
  }
  func.func @transform_2(%arg0: i32) -> (i32, i32, i32) {
    %c0_i32 = arith.constant 0 : i32
    %c0_i32_0 = arith.constant 0 : i32
    %c0_i32_1 = arith.constant 0 : i32
    %c0_i32_2 = arith.constant 0 : i32
    return %c0_i32, %c0_i32_0, %c0_i32_1 : i32, i32, i32
  }
  func.func @transform_3(%arg0: i32) -> (i32, i32) {
    %c0_i32 = arith.constant 0 : i32
    %c0_i32_0 = arith.constant 0 : i32
    return %arg0, %c0_i32 : i32, i32
  }
}

</mosaic_0001>

<bundles_post_ra>
// kernel: ae_nosecond_forward.1
= control target key start
LH: loop header
LB: loop body
LE: loop exit
PB: predicated region body
PF: predicated region fallthrough
CT: control target
= control target key end

     0   :  { %s1501_s12 = smov 0   ;;  %s1781_s0 = inlined_call_operand.vmem [shape: f32[26,128], index: 0, kind: input, shape index: {}]   ;;  %s1782_s1 = inlined_call_operand.vmem [shape: bf16[7,128,128], index: 1, kind: input, shape index: {}]   ;;  %s1783_s2 = inlined_call_operand.vmem [shape: f32[6,1,128], index: 2, kind: input, shape index: {}]   ;;  %s1784_s3 = inlined_call_operand.vmem [shape: f32[26,128], index: 3, kind: output, shape index: {}]  }
   0x1 LB: > { %s1026_s13 = sadd.s32 4294967295, %s1477_s12   ;;  %p1030_p0 = scmp.ge.s32.totalorder %s1477_s12, 1  ;;  %s1477_s12 = sphi %s1501_s12, %s13_s12  }
   0x2   : > { %p136_p1 = scmp.lt.s32.totalorder %s1477_s12, 5 }
   0x4   : > { %p137_p2 = pnand %p1030_p0, %p136_p1 }
   0x5   : > { %v1411_v0 = vld [vmem:[%s1782_s1] sm:$0xff] (!%p137_p2)   ;;  %v1479_v1 = vmov (!%p137_p2), 0.0   ;;  %v1412_v2 = vld [vmem:[%s1782_s1 + $0x8] sm:$0xff] (!%p137_p2)   ;;  %vm1480_vm0 = vmmov (!%p137_p2), 0   ;;  %v1413_v3 = vld [vmem:[%s1782_s1 + $0x10] sm:$0xff] (!%p137_p2)   ;;  %p158_p3 = scmp.lt.s32.totalorder (!%p137_p2), %s1026_s13, 3 }
   0x6   : > { %140 = sbr.rel (%p137_p2) target bundleno = 1735 (0x6c7), region = 32  ;;  %1261 = vmatprep.subr.bf16.mxu0 (!%p137_p2), %v1479_v1  ;;  %1281 = vmatprep.subr.bf16.mxu1 (!%p137_p2), %v1479_v1  ;;  %v1419_v4 = vld [vmem:[%s1782_s1 + $0x40] sm:$0xff] (!%p137_p2)   ;;  %v1414_v5 = vld [vmem:[%s1782_s1 + $0x18] sm:$0xff] (!%p137_p2)   ;;  %v1420_v6 = vld [vmem:[%s1782_s1 + $0x48] sm:$0xff] (!%p137_p2)  }
   0x7   : > { %1262 = vmatpush3.bf16.msra.mxu0 (!%p137_p2), %v1411_v0  ;;  %1277 = vmatprep.mubr.msk.bf16.mxu0 (!%p137_p2), %vm1480_vm0, %v1479_v1  ;;  %v1415_v7 = vld [vmem:[%s1782_s1 + $0x20] sm:$0xff] (!%p137_p2)   ;;  %v1421_v8 = vld [vmem:[%s1782_s1 + $0x50] sm:$0xff] (!%p137_p2)   ;;  %v1416_v9 = vld [vmem:[%s1782_s1 + $0x28] sm:$0xff] (!%p137_p2)  }
   0x8   : > { %1263 = vmatprep.subr.bf16.mxu0 (!%p137_p2), %v1479_v1  ;;  %1297 = vmatprep.mubr.msk.bf16.mxu1 (!%p137_p2), %vm1480_vm0, %v1479_v1  ;;  %v1422_v10 = vld [vmem:[%s1782_s1 + $0x58] sm:$0xff] (!%p137_p2)   ;;  %v1417_v11 = vld [vmem:[%s1782_s1 + $0x30] sm:$0xff] (!%p137_p2)   ;;  %v1423_v12 = vld [vmem:[%s1782_s1 + $0x60] sm:$0xff] (!%p137_p2)  }
   0x9   : > { %1282 = vmatpush3.bf16.msra.mxu1 (!%p137_p2), %v1419_v4  ;;  %v1418_v13 = vld [vmem:[%s1782_s1 + $0x38] sm:$0xff] (!%p137_p2)   ;;  %v1424_v15 = vld [vmem:[%s1782_s1 + $0x68] sm:$0xff] (!%p137_p2)   ;;  %v1425_v17 = vld [vmem:[%s1782_s1 + $0x70] sm:$0xff] (!%p137_p2)  }
   0xa   : > { %1283 = vmatprep.subr.bf16.mxu1 (!%p137_p2), %v1479_v1  ;;  %v1426_v18 = vld [vmem:[%s1782_s1 + $0x78] sm:$0xff] (!%p137_p2)   ;;  %v1427_v19 = vld [vmem:[%s1782_s1 + $0x80] sm:$0xff] (!%p137_p2)   ;;  %v1428_v20 = vld [vmem:[%s1782_s1 + $0x88] sm:$0xff] (!%p137_p2)  }
   0xb   : > { %1264 = vmatpush3.bf16.msra.mxu0 (!%p137_p2), %v1412_v2  ;;  %v1429_v21 = vld [vmem:[%s1782_s1 + $0x90] sm:$0xff] (!%p137_p2)   ;;  %v1430_v22 = vld [vmem:[%s1782_s1 + $0x98] sm:$0xff] (!%p137_p2)   ;;  %v1431_v23 = vld [vmem:[%s1782_s1 + $0xa0] sm:$0xff] (!%p137_p2)  }
   0xc   : > { %1265 = vmatprep.subr.bf16.mxu0 (!%p137_p2), %v1479_v1  ;;  %v1432_v24 = vld [vmem:[%s1782_s1 + $0xa8] sm:$0xff] (!%p137_p2)   ;;  %v1033_v25 = vld [vmem:[%s1783_s2] ss:$0 sm:$0xff] (!%p137_p2)  ;;  %v1433_v33 = vld [vmem:[%s1782_s1 + $0xb0] sm:$0xff] (!%p137_p2)  }
   0xd   : > { %s1786_s13 = smov (!%p158_p3, %s1026_s13), 3  ;;  %1284 = vmatpush3.bf16.msra.mxu1 %v1420_v6  ;;  %v1434_v34 = vld [vmem:[%s1782_s1 + $0xb8] sm:$0xff]   ;;  %v1435_v35 = vld [vmem:[%s1782_s1 + $0xc0] sm:$0xff]   ;;  %v1436_v36 = vld [vmem:[%s1782_s1 + $0xc8] sm:$0xff]  }
   0xe   : > { %s1031_s28 = sshll.u32 %s1786_s13, 3  ;;  %1285 = vmatprep.subr.bf16.mxu1 %v1479_v1  ;;  %v1437_v37 = vld [vmem:[%s1782_s1 + $0xd0] sm:$0xff]   ;;  %v1438_v38 = vld [vmem:[%s1782_s1 + $0xd8] sm:$0xff]   ;;  %v1439_v39 = vld [vmem:[%s1782_s1 + $0xe0] sm:$0xff]  }
   0xf   : > { %1266 = vmatpush3.bf16.msra.mxu0 %v1413_v3  ;;  %s161_s14 = scalar_lea.vmem %s1781_s0, %s1031_s28  ;;  %v1440_v40 = vld [vmem:[%s1782_s1 + $0xe8] sm:$0xff]   ;;  %v1059_v41 = vld [vmem:[%s1783_s2 + $0x1] ss:$0 sm:$0xff]  ;;  %v1441_v49 = vld [vmem:[%s1782_s1 + $0xf0] sm:$0xff]   ;;  %s165_s23 = scalar_lea.vmem %s1784_s3, %s1031_s28 }
  0x10   : > { %1267 = vmatprep.subr.bf16.mxu0 %v1479_v1  ;;  %v167_v14 = vld [vmem:[%s161_s14] sm:$0xff]  ;;  %v1442_v50 = vld [vmem:[%s1782_s1 + $0xf8] sm:$0xff]   ;;  %v1444_v52 = vld [vmem:[%s1782_s1 + $0x108] sm:$0xff]  }
  0x11   : > { %1286 = vmatpush3.bf16.msra.mxu1 %v1421_v8  ;;  %v168_v16 = vpack.c.bf16 %v167_v14, %v167_v14  ;;  %v1443_v51 = vld [vmem:[%s1782_s1 + $0x100] sm:$0xff]   ;;  %v1445_v53 = vld [vmem:[%s1782_s1 + $0x110] sm:$0xff]   ;;  %v1446_v54 = vld [vmem:[%s1782_s1 + $0x118] sm:$0xff]  }
  0x12   : > { %1287 = vmatprep.subr.bf16.mxu1 %v1479_v1  ;;  %v1447_v55 = vld [vmem:[%s1782_s1 + $0x120] sm:$0xff]   ;;  %v1448_v56 = vld [vmem:[%s1782_s1 + $0x128] sm:$0xff]   ;;  %v1449_v2 = vld [vmem:[%s1782_s1 + $0x130] sm:$0xff]  }
  0x13   : > { %1268 = vmatpush3.bf16.msra.mxu0 %v1414_v5  ;;  %v1085_v57 = vld [vmem:[%s1783_s2 + $0x2] ss:$0 sm:$0xff]  ;;  %v1450_v3 = vld [vmem:[%s1782_s1 + $0x138] sm:$0xff]   ;;  %v1452_v5 = vld [vmem:[%s1782_s1 + $0x148] sm:$0xff]  }
  0x14   : > { %1269 = vmatprep.subr.bf16.mxu0 %v1479_v1  ;;  %v1451_v4 = vld [vmem:[%s1782_s1 + $0x140] sm:$0xff]   ;;  %v1453_v6 = vld [vmem:[%s1782_s1 + $0x150] sm:$0xff]  }
  0x15   : > { %1288 = vmatpush3.bf16.msra.mxu1 %v1422_v10  ;;  %v1455_v8 = vld [vmem:[%s1782_s1 + $0x160] sm:$0xff]  }
  0x16   : > { %1289 = vmatprep.subr.bf16.mxu1 %v1479_v1  ;;  %v1111_v10 = vld [vmem:[%s1783_s2 + $0x3] ss:$0 sm:$0xff] }
  0x17   : > { %1270 = vmatpush3.bf16.msra.mxu0 %v1415_v7  ;;  %v1454_v7 = vld [vmem:[%s1782_s1 + $0x158] sm:$0xff]  }
  0x18   : > { %1271 = vmatprep.subr.bf16.mxu0 %v1479_v1 }
  0x19   : > { %1290 = vmatpush3.bf16.msra.mxu1 %v1423_v12 }
  0x1a   : > { %1291 = vmatprep.subr.bf16.mxu1 %v1479_v1 }
  0x1b   : > { %1272 = vmatpush3.bf16.msra.mxu0 %v1416_v9  ;;  %v1456_v9 = vld [vmem:[%s1782_s1 + $0x168] sm:$0xff]  }
  0x1c   : > { %1273 = vmatprep.subr.bf16.mxu0 %v1479_v1 }
  0x1d   : > { %1292 = vmatpush3.bf16.msra.mxu1 %v1424_v15 }
  0x1e   : > { %1293 = vmatprep.subr.bf16.mxu1 %v1479_v1 }
  0x1f   : > { %1274 = vmatpush3.bf16.msra.mxu0 %v1417_v11 }
  0x20   : > { %1275 = vmatprep.subr.bf16.mxu0 %v1479_v1 }
  0x21   : > { %1294 = vmatpush3.bf16.msra.mxu1 %v1425_v17 }
  0x22   : > { %1295 = vmatprep.subr.bf16.mxu1 %v1479_v1 }
  0x23   : > { %1276 = vmatpush3.bf16.msra.mxu0 %v1418_v13 }
  0x24   : > { %1301 = vmatprep.subr.bf16.mxu0 %v1479_v1 }
  0x25   : > { %1296 = vmatpush3.bf16.msra.mxu1 %v1426_v18  ;;  %v1457_v18 = vld [vmem:[%s1782_s1 + $0x170] sm:$0xff]  }
  0x26   : > { %1278 = vmatmul.mubr.bf16.vlgmr.msra.gmra.mrb[0].mxu0 %v168_v16  ;;  %1321 = vmatprep.subr.bf16.mxu1 %v1479_v1 }
  0x27   : > { %1317 = vmatprep.mubr.msk.bf16.mxu0 %vm1480_vm0, %v1479_v1  ;;  %1302 = vmatpush3.bf16.msra.mxu0 %v1427_v19  ;;  %v1458_v19 = vld [vmem:[%s1782_s1 + $0x178] sm:$0xff]  }
  0x28   : > { %1303 = vmatprep.subr.bf16.mxu0 %v1479_v1 }
  0x2b   : > { %1304 = vmatpush3.bf16.msra.mxu0 %v1428_v20  ;;  %v1137_v20 = vld [vmem:[%s1783_s2 + $0x4] ss:$0 sm:$0xff] }
  0x2c   : > { %1305 = vmatprep.subr.bf16.mxu0 %v1479_v1 }
  0x2f   : > { %1306 = vmatpush3.bf16.msra.mxu0 %v1429_v21 }
  0x30   : > { %1307 = vmatprep.subr.bf16.mxu0 %v1479_v1 }
  0x33   : > { %1308 = vmatpush3.bf16.msra.mxu0 %v1430_v22 }
  0x34   : > { %1309 = vmatprep.subr.bf16.mxu0 %v1479_v1 }
  0x37   : > { %1310 = vmatpush3.bf16.msra.mxu0 %v1431_v23 }
  0x38   : > { %1311 = vmatprep.subr.bf16.mxu0 %v1479_v1 }
  0x3b   : > { %1312 = vmatpush3.bf16.msra.mxu0 %v1432_v24 }
  0x3c   : > { %1313 = vmatprep.subr.bf16.mxu0 %v1479_v1 }
  0x3f   : > { %1314 = vmatpush3.bf16.msra.mxu0 %v1433_v33 }
  0x40   : > { %1315 = vmatprep.subr.bf16.mxu0 %v1479_v1 }
  0x43   : > { %1316 = vmatpush3.bf16.msra.mxu0 %v1434_v34 }
  0x44   : > { %1341 = vmatprep.subr.bf16.mxu0 %v1479_v1 }
  0xf9   : > { %v274_v26 = vpop.f32.mrb[0].mxu0 }
  0xfa   : > { %v275_v27 = vadd.f32 %v1033_v25, %v274_v26  ;;  %v1279_v28 = vpop.f32.mrb[1].mxu0 }
  0xfb   : > { %v277_v29 = vpop.f32.mrb[2].mxu0  ;;  %v1459_v28 = vld [vmem:[%s1782_s1 + $0x180] sm:$0xff]  }
  0xfc   : > { %v280_v30 = vmax.f32 %v275_v27, 0.0  ;;  %v1280_v31 = vpop.f32.mrb[3].mxu0  ;;  %v1460_v29 = vld [vmem:[%s1782_s1 + $0x188] sm:$0xff]  }
  0xfd   : > { %v1462_v31 = vld [vmem:[%s1782_s1 + $0x198] sm:$0xff]  }
  0xfe   : > { %v281_v32 = vpack.c.bf16 %v280_v30, %v280_v30  ;;  %v1461_v30 = vld [vmem:[%s1782_s1 + $0x190] sm:$0xff]  }
 0x100   : > { %1298 = vmatmul.mubr.bf16.vlgmr.msra.gmra.mrb[0].mxu1 %v281_v32  ;;  %v1163_v32 = vld [vmem:[%s1783_s2 + $0x5] ss:$0 sm:$0xff] }
 0x101   : > { %1337 = vmatprep.mubr.msk.bf16.mxu1 %vm1480_vm0, %v1479_v1  ;;  %1322 = vmatpush3.bf16.msra.mxu1 %v1435_v35 }
 0x102   : > { %1323 = vmatprep.subr.bf16.mxu1 %v1479_v1 }
 0x105   : > { %1324 = vmatpush3.bf16.msra.mxu1 %v1436_v36 }
 0x106   : > { %1325 = vmatprep.subr.bf16.mxu1 %v1479_v1 }
 0x109   : > { %1326 = vmatpush3.bf16.msra.mxu1 %v1437_v37 }
 0x10a   : > { %1327 = vmatprep.subr.bf16.mxu1 %v1479_v1 }
 0x10d   : > { %1328 = vmatpush3.bf16.msra.mxu1 %v1438_v38  ;;  %v1463_v38 = vld [vmem:[%s1782_s1 + $0x1a0] sm:$0xff]  }
 0x10e   : > { %1329 = vmatprep.subr.bf16.mxu1 %v1479_v1 }
 0x111   : > { %1330 = vmatpush3.bf16.msra.mxu1 %v1439_v39  ;;  %v1464_v39 = vld [vmem:[%s1782_s1 + $0x1a8] sm:$0xff]  }
 0x112   : > { %1331 = vmatprep.subr.bf16.mxu1 %v1479_v1 }
 0x115   : > { %1332 = vmatpush3.bf16.msra.mxu1 %v1440_v40  ;;  %v1465_v40 = vld [vmem:[%s1782_s1 + $0x1b0] sm:$0xff]  }
 0x116   : > { %1333 = vmatprep.subr.bf16.mxu1 %v1479_v1 }
 0x119   : > { %1334 = vmatpush3.bf16.msra.mxu1 %v1441_v49 }
 0x11a   : > { %1335 = vmatprep.subr.bf16.mxu1 %v1479_v1 }
 0x11d   : > { %1336 = vmatpush3.bf16.msra.mxu1 %v1442_v50 }
 0x11e   : > { %1361 = vmatprep.subr.bf16.mxu1 %v1479_v1 }
 0x1d3   : > { %v389_v42 = vpop.f32.mrb[0].mxu1 }
 0x1d4   : > { %v390_v43 = vadd.f32 %v1059_v41, %v389_v42  ;;  %v1299_v44 = vpop.f32.mrb[1].mxu1  ;;  %v1466_v41 = vld [vmem:[%s1782_s1 + $0x1b8] sm:$0xff]  }
 0x1d5   : > { %v392_v45 = vpop.f32.mrb[2].mxu1 }
 0x1d6   : > { %v395_v46 = vmax.f32 %v390_v43, 0.0  ;;  %v1300_v47 = vpop.f32.mrb[3].mxu1 }
 0x1d8   : > { %v396_v48 = vpack.c.bf16 %v395_v46, %v395_v46 }
 0x1da   : > { %1318 = vmatmul.mubr.bf16.vlgmr.msra.gmra.mrb[4].mxu0 %v396_v48 }
 0x1db   : > { %1357 = vmatprep.mubr.msk.bf16.mxu0 %vm1480_vm0, %v1479_v1  ;;  %1342 = vmatpush3.bf16.msra.mxu0 %v1443_v51 }
 0x1dc   : > { %1343 = vmatprep.subr.bf16.mxu0 %v1479_v1 }
 0x1df   : > { %1344 = vmatpush3.bf16.msra.mxu0 %v1444_v52 }
 0x1e0   : > { %1345 = vmatprep.subr.bf16.mxu0 %v1479_v1 }
 0x1e3   : > { %1346 = vmatpush3.bf16.msra.mxu0 %v1445_v53 }
 0x1e4   : > { %1347 = vmatprep.subr.bf16.mxu0 %v1479_v1 }
 0x1e7   : > { %1348 = vmatpush3.bf16.msra.mxu0 %v1446_v54 }
 0x1e8   : > { %1349 = vmatprep.subr.bf16.mxu0 %v1479_v1 }
 0x1eb   : > { %1350 = vmatpush3.bf16.msra.mxu0 %v1447_v55 }
 0x1ec   : > { %1351 = vmatprep.subr.bf16.mxu0 %v1479_v1 }
 0x1ef   : > { %1352 = vmatpush3.bf16.msra.mxu0 %v1448_v56 }
 0x1f0   : > { %1353 = vmatprep.subr.bf16.mxu0 %v1479_v1 }
 0x1f3   : > { %1354 = vmatpush3.bf16.msra.mxu0 %v1449_v2 }
 0x1f4   : > { %1355 = vmatprep.subr.bf16.mxu0 %v1479_v1 }
 0x1f7   : > { %1356 = vmatpush3.bf16.msra.mxu0 %v1450_v3 }
 0x1f8   : > { %1381 = vmatprep.subr.bf16.mxu0 %v1479_v1 }
 0x2ad   : > { %v504_v58 = vpop.f32.mrb[4].mxu0 }
 0x2ae   : > { %v505_v59 = vadd.f32 %v1085_v57, %v504_v58  ;;  %v1319_v60 = vpop.f32.mrb[5].mxu0 }
 0x2af   : > { %v507_v61 = vpop.f32.mrb[6].mxu0 }
 0x2b0   : > { %v510_v62 = vmax.f32 %v505_v59, 0.0  ;;  %v1320_v63 = vpop.f32.mrb[7].mxu0 }
 0x2b2   : > { %v511_v0 = vpack.c.bf16 %v510_v62, %v510_v62 }
 0x2b4   : > { %1338 = vmatmul.mubr.bf16.vlgmr.msra.gmra.mrb[4].mxu1 %v511_v0 }
 0x2b5   : > { %1377 = vmatprep.mubr.msk.bf16.mxu1 %vm1480_vm0, %v1479_v1  ;;  %1362 = vmatpush3.bf16.msra.mxu1 %v1451_v4 }
 0x2b6   : > { %1363 = vmatprep.subr.bf16.mxu1 %v1479_v1 }
 0x2b9   : > { %1364 = vmatpush3.bf16.msra.mxu1 %v1452_v5 }
 0x2ba   : > { %1365 = vmatprep.subr.bf16.mxu1 %v1479_v1 }
 0x2bd   : > { %1366 = vmatpush3.bf16.msra.mxu1 %v1453_v6 }
 0x2be   : > { %1367 = vmatprep.subr.bf16.mxu1 %v1479_v1 }
 0x2c1   : > { %1368 = vmatpush3.bf16.msra.mxu1 %v1454_v7 }
 0x2c2   : > { %1369 = vmatprep.subr.bf16.mxu1 %v1479_v1 }
 0x2c5   : > { %1370 = vmatpush3.bf16.msra.mxu1 %v1455_v8 }
 0x2c6   : > { %1371 = vmatprep.subr.bf16.mxu1 %v1479_v1 }
 0x2c9   : > { %1372 = vmatpush3.bf16.msra.mxu1 %v1456_v9 }
 0x2ca   : > { %1373 = vmatprep.subr.bf16.mxu1 %v1479_v1 }
 0x2cd   : > { %1374 = vmatpush3.bf16.msra.mxu1 %v1457_v18 }
 0x2ce   : > { %1375 = vmatprep.subr.bf16.mxu1 %v1479_v1 }
 0x2d1   : > { %1376 = vmatpush3.bf16.msra.mxu1 %v1458_v19 }
 0x387   : > { %v619_v11 = vpop.f32.mrb[4].mxu1 }
 0x388   : > { %v620_v12 = vadd.f32 %v1111_v10, %v619_v11  ;;  %v1339_v13 = vpop.f32.mrb[5].mxu1 }
 0x389   : > { %v622_v14 = vpop.f32.mrb[6].mxu1 }
 0x38a   : > { %v625_v15 = vmax.f32 %v620_v12, 0.0  ;;  %v1340_v16 = vpop.f32.mrb[7].mxu1 }
 0x38c   : > { %v626_v17 = vpack.c.bf16 %v625_v15, %v625_v15 }
 0x38e   : > { %1358 = vmatmul.mubr.bf16.vlgmr.msra.gmra.mrb[8].mxu0 %v626_v17 }
 0x38f   : > { %1397 = vmatprep.mubr.msk.bf16.mxu0 %vm1480_vm0, %v1479_v1  ;;  %1382 = vmatpush3.bf16.msra.mxu0 %v1459_v28 }
 0x390   : > { %1383 = vmatprep.subr.bf16.mxu0 %v1479_v1 }
 0x393   : > { %1384 = vmatpush3.bf16.msra.mxu0 %v1460_v29 }
 0x394   : > { %1385 = vmatprep.subr.bf16.mxu0 %v1479_v1 }
 0x397   : > { %1386 = vmatpush3.bf16.msra.mxu0 %v1461_v30 }
 0x398   : > { %1387 = vmatprep.subr.bf16.mxu0 %v1479_v1 }
 0x39b   : > { %1388 = vmatpush3.bf16.msra.mxu0 %v1462_v31 }
 0x39c   : > { %1389 = vmatprep.subr.bf16.mxu0 %v1479_v1 }
 0x39f   : > { %1390 = vmatpush3.bf16.msra.mxu0 %v1463_v38 }
 0x3a0   : > { %1391 = vmatprep.subr.bf16.mxu0 %v1479_v1 }
 0x3a3   : > { %1392 = vmatpush3.bf16.msra.mxu0 %v1464_v39 }
 0x3a4   : > { %1393 = vmatprep.subr.bf16.mxu0 %v1479_v1 }
 0x3a7   : > { %1394 = vmatpush3.bf16.msra.mxu0 %v1465_v40 }
 0x3a8   : > { %1395 = vmatprep.subr.bf16.mxu0 %v1479_v1 }
 0x3ab   : > { %1396 = vmatpush3.bf16.msra.mxu0 %v1466_v41 }
 0x461   : > { %v734_v21 = vpop.f32.mrb[8].mxu0 }
 0x462   : > { %v735_v22 = vadd.f32 %v1137_v20, %v734_v21  ;;  %v1359_v23 = vpop.f32.mrb[9].mxu0 }
 0x463   : > { %v737_v24 = vpop.f32.mrb[10].mxu0 }
 0x464   : > { %v740_v25 = vmax.f32 %v735_v22, 0.0  ;;  %v1360_v26 = vpop.f32.mrb[11].mxu0 }
 0x466   : > { %v741_v27 = vpack.c.bf16 %v740_v25, %v740_v25 }
 0x468   : > { %1378 = vmatmul.mubr.bf16.vlgmr.msra.gmra.mrb[8].mxu1 %v741_v27 }
 0x53b   : > { %v849_v33 = vpop.f32.mrb[8].mxu1 }
 0x53c   : > { %v850_v34 = vadd.f32 %v1163_v32, %v849_v33  ;;  %v1379_v35 = vpop.f32.mrb[9].mxu1 }
 0x53d   : > { %v852_v36 = vpop.f32.mrb[10].mxu1 }
 0x53e   : > { %v1380_v37 = vpop.f32.mrb[11].mxu1  ;;  %855 = vmax.xlane.f32.xlu0 %v850_v34 }
 0x5cb   : > { %v856_v42 = vpop.xlane.xlu0 %855 }
 0x5cc   : > { %v857_v43 = vsub.f32 %v850_v34, %v856_v42 }
 0x5ce   : > { %v858_v44 = vmul.f32 1.442695, %v857_v43 }
 0x5d0   : > { %1467 = vpow2.f32 %v858_v44 }
 0x5da   : > { %v1468_v45 = vpop.eup %1467 }
 0x5db   : > { %v860_v46 = vpack.c.bf16 %v1468_v45, %v1468_v45 }
 0x5dd   : > { %1398 = vmatmul.mubr.bf16.vlgmr.msra.gmra.mrb[12].mxu0 %v860_v46 }
 0x6b0   : > { %v960_v47 = vpop.f32.mrb[12].mxu0 }
 0x6b1   : > { %v966_v48 = vmax.f32 %v960_v47, 1e-30  ;;  %v1399_v49 = vpop.f32.mrb[13].mxu0 }
 0x6b2   : > { %v963_v50 = vpop.f32.mrb[14].mxu0 }
 0x6b3   : > { %1469 = vrcp.f32 %v966_v48  ;;  %v1400_v51 = vpop.f32.mrb[15].mxu0 }
 0x6bd   : > { %v1470_v52 = vpop.eup %1469 }
 0x6be   : > { %v968_v53 = vmul.f32 %v1470_v52, %v966_v48 }
 0x6c0   : > { %v969_v54 = vsub.f32 2.0, %v968_v53 }
 0x6c2   : > { %v970_v55 = vmul.f32 %v1470_v52, %v969_v54 }
 0x6c4   : > { %v971_v1 = vmul.f32 %v1468_v45, %v970_v55 }
 0x6c6   : > { %972 = vst [vmem:[%s165_s23] sm:$0xff] %v971_v1 }
 0x6c7 PF: > { %s13_s12 = sadd.s32 1, %s1477_s12  }
 0x6c8   : > { %p10_p4 = scmp.ge.s32.totalorder %s13_s12, 6  }
 0x6ca   :  { %12 = sbr.rel (!%p10_p4) target bundleno = 1 (0x1), region = 73 }

</bundles_post_ra>
